<compile_context>
chip_gen: v5e
topology: v5e:2x2
jax: 0.10.0
libtpu: 0.0.40
codegen_flags: <defaults>
</compile_context>

<pallas_src>
import jax
import jax.numpy as jnp
from jax.experimental import pallas as pl
from jax.experimental.pallas import tpu as pltpu


# --------------------------------------------------------------------------
# Tiling / VMEM budget helpers
# --------------------------------------------------------------------------
_LANE = 128
_SUBLANE = 8

# Conservative budget that fits every generation once double-buffered:
# v5e/v6e have 128 MiB physical VMEM, v7x only 64 MiB -> keep the pipelined
# footprint well under 64 MiB and never request more than 56 MiB scoped.
_VMEM_FOOTPRINT_BUDGET = 44 * 1024 * 1024
_VMEM_LIMIT_CAP = 56 * 1024 * 1024

_TM_MAX = 256                       # 256-row MXU on v6e / v7x
_TN_CANDIDATES = (512, 256, 128)    # lane-dense, multiple of 128
_TK_CANDIDATES = (2048, 1024, 512, 256, 128)


def _round_up(x, m):
    return (x + m - 1) // m * m


def _footprint_bytes(tm, tk, tn):
    """Double-buffered VMEM footprint of one pipeline stage (bytes)."""
    act = 2 * tm * tk * 2           # bf16 activation tile, 2 buffers
    wgt = 2 * tk * tn * 2           # bf16 weight tile, 2 buffers
    bias = 2 * tn * 4               # f32 bias tile, 2 buffers
    out = 2 * tm * tn * 4           # f32 output tile, 2 buffers
    acc = tm * tn * 4               # f32 accumulator scratch
    return act + wgt + bias + out + acc


def _choose_weight_tiling(D, H):
    """Pick (tn, tk, Kp, Hp) from the weight shape only (batch independent)."""
    Hp = _round_up(H, _LANE)
    tn = _LANE
    for cand in _TN_CANDIDATES:
        if Hp % cand == 0:
            tn = cand
            break

    Kp128 = _round_up(D, _LANE)
    # Prefer the whole reduction in one grid step (no K-axis revisits, no
    # per-K pipeline overhead) when it fits the budget at the largest tm.
    tk = _LANE
    for cand in (Kp128,) + _TK_CANDIDATES:
        if _footprint_bytes(_TM_MAX, cand, tn) <= _VMEM_FOOTPRINT_BUDGET:
            tk = cand
            break
    Kp = _round_up(D, tk)
    return tn, tk, Kp, Hp


# --------------------------------------------------------------------------
# Kernel
# --------------------------------------------------------------------------
def _linear_relu_kernel(x_ref, w_ref, b_ref, o_ref, acc_ref):
    """out[i,j] = relu(sum_k x[i,k] @ w[k,j] + b[j]); f32 accumulation."""
    k = pl.program_id(2)

    @pl.when(k == 0)
    def _init():
        # Fold the bias into the accumulator init: finalize is just max+cast.
        acc_ref[...] = jnp.broadcast_to(b_ref[...], acc_ref.shape)

    acc_ref[...] += jnp.dot(
        x_ref[...], w_ref[...], preferred_element_type=jnp.float32
    )

    @pl.when(k == pl.num_programs(2) - 1)
    def _finalize():
        o_ref[...] = jnp.maximum(acc_ref[...], 0.0).astype(o_ref.dtype)


# --------------------------------------------------------------------------
# Wrapper: pallas_call with pre-padded (bf16) weights
# --------------------------------------------------------------------------
def linear_relu_pallas(x2d, w_padded, b_padded, *, d_in, h_out, tn, tk,
                       out_dtype=jnp.float32):
    """x2d: [B, d_in] f32, w_padded: [Kp, Hp] bf16, b_padded: [1, Hp] f32.

    Returns [B, h_out] = relu(x @ w + b) with f32 MXU accumulation.
    """
    B, D = x2d.shape
    assert D == d_in, (D, d_in)
    Kp, Hp = w_padded.shape

    tm = min(_TM_MAX, _round_up(B, _SUBLANE))
    Mp = _round_up(B, tm)

    # Zero padding is harmless: padded K columns contribute 0; padded M rows /
    # N cols are sliced away below.
    xp = jnp.pad(x2d.astype(jnp.bfloat16), ((0, Mp - B), (0, Kp - D)))

    ni, nj, nk = Mp // tm, Hp // tn, Kp // tk

    # Megacore (v7x, 2 TCs): lead with whichever parallel axis has more
    # blocks so a single-block axis never leaves one TensorCore idle.
    if nj >= ni:
        grid = (nj, ni, nk)
        x_spec = pl.BlockSpec((tm, tk), lambda j, i, k: (i, k))
        w_spec = pl.BlockSpec((tk, tn), lambda j, i, k: (k, j))
        b_spec = pl.BlockSpec((1, tn), lambda j, i, k: (0, j))
        o_spec = pl.BlockSpec((tm, tn), lambda j, i, k: (i, j))
    else:
        grid = (ni, nj, nk)
        x_spec = pl.BlockSpec((tm, tk), lambda i, j, k: (i, k))
        w_spec = pl.BlockSpec((tk, tn), lambda i, j, k: (k, j))
        b_spec = pl.BlockSpec((1, tn), lambda i, j, k: (0, j))
        o_spec = pl.BlockSpec((tm, tn), lambda i, j, k: (i, j))

    out_bytes = Mp * Hp * jnp.dtype(out_dtype).itemsize
    cost = pl.CostEstimate(
        flops=2 * Mp * Kp * Hp,
        transcendentals=0,
        # Account for re-streaming: activations re-read per N block, weights
        # re-read per M block.
        bytes_accessed=nj * Mp * Kp * 2 + ni * Kp * Hp * 2 + 4 * Hp + out_bytes,
    )

    footprint = _footprint_bytes(tm, tk, tn)
    vmem_limit = int(min(_VMEM_LIMIT_CAP,
                         max(32 * 1024 * 1024, footprint + (8 << 20))))

    out_padded = pl.pallas_call(
        _linear_relu_kernel,
        out_shape=jax.ShapeDtypeStruct((Mp, Hp), out_dtype),
        grid=grid,
        in_specs=[x_spec, w_spec, b_spec],
        out_specs=o_spec,
        scratch_shapes=[pltpu.VMEM((tm, tn), jnp.float32)],
        compiler_params=pltpu.CompilerParams(
            dimension_semantics=("parallel", "parallel", "arbitrary"),
            vmem_limit_bytes=vmem_limit,
        ),
        cost_estimate=cost,
    )(xp, w_padded, b_padded)

    return out_padded[:B, :h_out]


# --------------------------------------------------------------------------
# Representative inner model + dict-wrapper Model (framework/Model.py port)
# --------------------------------------------------------------------------
class InnerModel:
    """Representative inner nn.Module: Flatten -> Linear -> ReLU (Pallas)."""

    def __init__(self, in_features, hidden, key):
        kw, kb = jax.random.split(key)
        self.w = jax.random.normal(kw, (in_features, hidden), jnp.float32) * 0.02
        self.b = jax.random.normal(kb, (hidden,), jnp.float32) * 0.02
        self.in_features = in_features
        self.hidden = hidden

        # Hoisted weight prep: bf16 cast + tile padding happens ONCE here,
        # not per forward() (removes a full weight HBM round-trip per call).
        # TODO(synk): int8 weights (v5e/v6e MXU) or fp8 (v7x MXU) would halve
        # weight HBM bytes again for this bandwidth-bound layer.
        tn, tk, Kp, Hp = _choose_weight_tiling(in_features, hidden)
        self._tn, self._tk = tn, tk
        self.w_padded = jnp.pad(
            self.w.astype(jnp.bfloat16),
            ((0, Kp - in_features), (0, Hp - hidden)))
        self.b_padded = jnp.pad(
            self.b.astype(jnp.float32), (0, Hp - hidden)).reshape(1, Hp)

    def __call__(self, data_nchw):
        B = data_nchw.shape[0]
        x2d = data_nchw.reshape(B, -1)  # flatten NCHW -> [B, C*H*W]
        return linear_relu_pallas(
            x2d, self.w_padded, self.b_padded,
            d_in=self.in_features, h_out=self.hidden,
            tn=self._tn, tk=self._tk)


class Model:
    """JAX port of framework/Model.py: dict-in / dict-out wrapper."""

    def __init__(self, model):
        self._model = model
        self._device = "tpu"
        self._device_id = [0]
        self._non_blocking = False
        if self._model and not callable(self._model):
            raise ValueError("error : forward() is not defined in _model.")

    def check_available(self) -> bool:
        return bool(self._model)

    def set_run_type(self, device, device_ids, non_blocking):
        # TODO(synk): .cpu()/.cuda()/DataParallel device placement has no
        # Pallas equivalent; JAX arrays already live on the default TPU backend.
        self._device = device
        self._device_id = device_ids
        self._non_blocking = non_blocking

    def forward(self, **kwargs) -> dict:
        data = kwargs["data"]                 # .to(device) is a no-op on TPU
        out = self._model(data)
        kwargs["out"] = out
        return kwargs

    # TODO(synk): load()/save() (torch state_dict serialization) intentionally
    # omitted — no file I/O in this self-contained script.


# --------------------------------------------------------------------------
# Demo / correctness check
# --------------------------------------------------------------------------
if __name__ == "__main__":
    key = jax.random.PRNGKey(0)
    k_param, k_data = jax.random.split(key)

    B, C, Hs, Ws = 2, 4, 16, 16
    HIDDEN = 32
    in_features = C * Hs * Ws

    inner = InnerModel(in_features, HIDDEN, k_param)
    model = Model(inner)
    model.set_run_type("tpu", [0], False)

    data = jax.random.normal(k_data, (B, C, Hs, Ws), jnp.float32)

    result = model.forward(data=data, tag="example")
    out = jax.block_until_ready(result["out"])

    # Reference with the same bf16 operand rounding the kernel uses
    # (f32 accumulation in both cases).
    x2d = data.reshape(B, -1)
    x_bf = x2d.astype(jnp.bfloat16).astype(jnp.float32)
    w_bf = inner.w.astype(jnp.bfloat16).astype(jnp.float32)
    ref = jnp.maximum(x_bf @ w_bf + inner.b, 0.0)

    assert out.shape == (B, HIDDEN)
    assert result["tag"] == "example"
    assert jnp.allclose(out, ref, atol=2e-3, rtol=2e-3)

    print("KERNEL_OK")
</pallas_src>

<mosaic_0001>
module attributes {stable_mosaic.version = 11 : i64} {
  func.func @_linear_relu_kernel(%arg0: i32, %arg1: i32, %arg2: i32, %arg3: memref<8x1024xbf16, #tpu.memory_space<vmem>>, %arg4: memref<1024x128xbf16, #tpu.memory_space<vmem>>, %arg5: memref<1x128xf32, #tpu.memory_space<vmem>>, %arg6: memref<8x128xf32, #tpu.memory_space<vmem>>, %arg7: memref<8x128xf32, #tpu.memory_space<vmem>>) attributes {dimension_semantics = [#tpu.dimension_semantics<parallel>, #tpu.dimension_semantics<parallel>, #tpu.dimension_semantics<arbitrary>], iteration_bounds = array<i64: 1, 1, 1>, scalar_prefetch = 0 : i64, scratch_operands = 1 : i64, tpu.core_type = #tpu.core_type<tc>, window_params = [{transform_indices = @transform_0, window_bounds = array<i64: 8, 1024>}, {transform_indices = @transform_1, window_bounds = array<i64: 1024, 128>}, {transform_indices = @transform_2, window_bounds = array<i64: 1, 128>}, {transform_indices = @transform_3, window_bounds = array<i64: 8, 128>}]} {
    %c0_i32 = arith.constant 0 : i32
    %0 = arith.cmpi eq, %arg2, %c0_i32 : i32
    %1 = arith.extui %0 : i1 to i32
    %c0_i32_0 = arith.constant 0 : i32
    %2 = arith.cmpi ne, %1, %c0_i32_0 : i32
    scf.if %2 {
      %c0_10 = arith.constant 0 : index
      %c0_11 = arith.constant 0 : index
      %12 = vector.load %arg5[%c0_10, %c0_11] : memref<1x128xf32, #tpu.memory_space<vmem>>, vector<1x128xf32>
      %13 = vector.shape_cast %12 : vector<1x128xf32> to vector<1x128xf32>
      %14 = vector.broadcast %13 : vector<1x128xf32> to vector<8x128xf32>
      %c0_12 = arith.constant 0 : index
      %c0_13 = arith.constant 0 : index
      %15 = vector.load %arg7[%c0_12, %c0_13] : memref<8x128xf32, #tpu.memory_space<vmem>>, vector<8x128xf32>
      tpu.vector_store %arg7[%c0_12, %c0_13], %14 {strides = array<i32>} : memref<8x128xf32, #tpu.memory_space<vmem>>, vector<8x128xf32>,
    } else {
    }
    %c0 = arith.constant 0 : index
    %c0_1 = arith.constant 0 : index
    %3 = vector.load %arg7[%c0, %c0_1] : memref<8x128xf32, #tpu.memory_space<vmem>>, vector<8x128xf32>
    %c0_2 = arith.constant 0 : index
    %c0_3 = arith.constant 0 : index
    %4 = vector.load %arg3[%c0_2, %c0_3] : memref<8x1024xbf16, #tpu.memory_space<vmem>>, vector<8x1024xbf16>
    %c0_4 = arith.constant 0 : index
    %c0_5 = arith.constant 0 : index
    %5 = vector.load %arg4[%c0_4, %c0_5] : memref<1024x128xbf16, #tpu.memory_space<vmem>>, vector<1024x128xbf16>
    %cst = arith.constant dense<0.000000e+00> : vector<8x128xf32>
    %6 = tpu.matmul %4, %5, %cst {dimension_numbers = #tpu.dot_dimension_numbers<[1], [0], [0], [1], [0, 0, 1, 1], [], []>} : vector<8x1024xbf16>, vector<1024x128xbf16>, vector<8x128xf32> -> vector<8x128xf32>
    %7 = arith.addf %3, %6 : vector<8x128xf32>
    %c0_6 = arith.constant 0 : index
    %c0_7 = arith.constant 0 : index
    %8 = vector.load %arg7[%c0_6, %c0_7] : memref<8x128xf32, #tpu.memory_space<vmem>>, vector<8x128xf32>
    tpu.vector_store %arg7[%c0_6, %c0_7], %7 {strides = array<i32>} : memref<8x128xf32, #tpu.memory_space<vmem>>, vector<8x128xf32>,
    %c0_i32_8 = arith.constant 0 : i32
    %9 = arith.cmpi eq, %arg2, %c0_i32_8 : i32
    %10 = arith.extui %9 : i1 to i32
    %c0_i32_9 = arith.constant 0 : i32
    %11 = arith.cmpi ne, %10, %c0_i32_9 : i32
    scf.if %11 {
      %c0_10 = arith.constant 0 : index
      %c0_11 = arith.constant 0 : index
      %12 = vector.load %arg7[%c0_10, %c0_11] : memref<8x128xf32, #tpu.memory_space<vmem>>, vector<8x128xf32>
      %cst_12 = arith.constant 0.000000e+00 : f32
      %13 = vector.broadcast %cst_12 : f32 to vector<8x128xf32>
      %14 = arith.maximumf %12, %13 : vector<8x128xf32>
      %c0_13 = arith.constant 0 : index
      %c0_14 = arith.constant 0 : index
      %15 = vector.load %arg6[%c0_13, %c0_14] : memref<8x128xf32, #tpu.memory_space<vmem>>, vector<8x128xf32>
      tpu.vector_store %arg6[%c0_13, %c0_14], %14 {strides = array<i32>} : memref<8x128xf32, #tpu.memory_space<vmem>>, vector<8x128xf32>,
    } else {
    }
    return
  }
  func.func @transform_0(%arg0: i32, %arg1: i32, %arg2: i32) -> (i32, i32) {
    %c0_i32 = arith.constant 0 : i32
    return %arg1, %arg2 : i32, i32
  }
  func.func @transform_1(%arg0: i32, %arg1: i32, %arg2: i32) -> (i32, i32) {
    %c0_i32 = arith.constant 0 : i32
    return %arg2, %arg0 : i32, i32
  }
  func.func @transform_2(%arg0: i32, %arg1: i32, %arg2: i32) -> (i32, i32) {
    %c0_i32 = arith.constant 0 : i32
    %c0_i32_0 = arith.constant 0 : i32
    return %c0_i32, %arg0 : i32, i32
  }
  func.func @transform_3(%arg0: i32, %arg1: i32, %arg2: i32) -> (i32, i32) {
    %c0_i32 = arith.constant 0 : i32
    return %arg1, %arg0 : i32, i32
  }
}

</mosaic_0001>

<bundles_post_ra>
// kernel: tpu_custom_call.1
= control target key start
LH: loop header
LB: loop body
LE: loop exit
PB: predicated region body
PF: predicated region fallthrough
CT: control target
= control target key end

     0   :  { %8 = vsyncpa [#allocation4], 0  ;;  %s1170_s0 = inlined_call_operand.hbm [shape: bf16[8,1024], index: 0, kind: input, shape index: {}]   ;;  %s1171_s1 = inlined_call_operand.hbm [shape: bf16[1024,128], index: 1, kind: input, shape index: {}]   ;;  %s1172_s2 = inlined_call_operand.vmem [shape: f32[1,128], index: 2, kind: input, shape index: {}]   ;;  %s1173_s3 = inlined_call_operand.hbm [shape: f32[8,128], index: 3, kind: output, shape index: {}]  }
   0x1   :  { %9 = vsyncpa [#allocation7], 0 }
   0x2   :  { %10 = vsyncpa [#allocation5], 0  ;;  %s16_s14 = sshll.u32 %s1170_s0, 4  ;;  %s1133_s15 = smov [#allocation3]   ;;  %s17_s14 = int_to_ptr.hbm [resolvable:$true] %s16_s14 }
   0x3   :  { %s18_s16 = sshll.u32 %s1133_s15, 4  ;;  %s26_s19 = sshll.u32 %s1171_s1, 4  ;;  %s19_s16 = int_to_ptr.vmem [resolvable:$true] %s18_s16  ;;  %s27_s19 = int_to_ptr.hbm [resolvable:$true] %s26_s19 }
   0x4   :  { %21 = dma.hbm_to_vmem [thread:$0]  %s17_s14, 512, %s19_s16, [#allocation4]  }
   0x5   :  { %s1134_s20 = smov [#allocation6]   ;;  %s1135_s22 = smov 64  }
   0x6   :  { %s28_s21 = sshll.u32 %s1134_s20, 4  ;;  %s1136_s23 = smov 4   ;;  %s29_s21 = int_to_ptr.vmem [resolvable:$true] %s28_s21 }
   0x7   :  { %34 = dma.hbm_to_vmem [thread:$0]  %s27_s19, 8192, %s29_s21, [#allocation7], %s1135_s22, %s1135_s22, %s1136_s23  }
   0x8   :  { %1127 = dma.done.wait [#allocation4], 512  }
   0x9   :  { %1128 = vsyncadd [#allocation4], 4294966784 }
   0xa   :  { %1129 = dma.done.wait [#allocation7], 8192  }
   0xb   :  { %1130 = vsyncadd [#allocation7], 4294959104  ;;  %v992_v0 = vld [vmem:[#allocation6 + $0x38] sm:$0xff]  ;;  %v991_v4 = vld [vmem:[#allocation6 + $0x30] sm:$0xff]  ;;  %s1137_s24 = smov [#allocation8]   ;;  %s718_s28 = sshll.u32 %s1173_s3, 4  ;;  %s719_s28 = int_to_ptr.hbm [resolvable:$true] %s718_s28 }
   0xc   :  { %v1000_v1 = vld [vmem:[#allocation6 + $0x78] sm:$0xff]  ;;  %599 = vmatpush.bf16.msra.mxu0 %v992_v0  ;;  %v999_v5 = vld [vmem:[#allocation6 + $0x70] sm:$0xff]  ;;  %v990_v8 = vld [vmem:[#allocation6 + $0x28] sm:$0xff]  ;;  %s716_s25 = sshll.u32 %s1137_s24, 4  ;;  %s717_s25 = int_to_ptr.vmem [resolvable:$true] %s716_s25 }
   0xd   :  { %v1008_v2 = vld [vmem:[#allocation6 + $0xb8] sm:$0xff]  ;;  %612 = vmatpush.bf16.msra.mxu1 %v1000_v1  ;;  %v1007_v6 = vld [vmem:[#allocation6 + $0xb0] sm:$0xff]  ;;  %v998_v9 = vld [vmem:[#allocation6 + $0x68] sm:$0xff] }
   0xe   :  { %v1016_v3 = vld [vmem:[#allocation6 + $0xf8] sm:$0xff]  ;;  %625 = vmatpush.bf16.msra.mxu2 %v1008_v2  ;;  %v1015_v7 = vld [vmem:[#allocation6 + $0xf0] sm:$0xff]  ;;  %v1006_v10 = vld [vmem:[#allocation6 + $0xa8] sm:$0xff] }
   0xf   :  { %638 = vmatpush.bf16.msra.mxu3 %v1016_v3  ;;  %v1014_v11 = vld [vmem:[#allocation6 + $0xe8] sm:$0xff]  ;;  %v989_v12 = vld [vmem:[#allocation6 + $0x20] sm:$0xff]  ;;  %v988_v16 = vld [vmem:[#allocation6 + $0x18] sm:$0xff] }
  0x10   :  { %600 = vmatpush.bf16.msra.mxu0 %v991_v4  ;;  %v997_v13 = vld [vmem:[#allocation6 + $0x60] sm:$0xff]  ;;  %v996_v17 = vld [vmem:[#allocation6 + $0x58] sm:$0xff]  ;;  %v987_v20 = vld [vmem:[#allocation6 + $0x10] sm:$0xff] }
  0x11   :  { %613 = vmatpush.bf16.msra.mxu1 %v999_v5  ;;  %v1005_v14 = vld [vmem:[#allocation6 + $0xa0] sm:$0xff]  ;;  %v1004_v18 = vld [vmem:[#allocation6 + $0x98] sm:$0xff]  ;;  %v995_v21 = vld [vmem:[#allocation6 + $0x50] sm:$0xff] }
  0x12   :  { %626 = vmatpush.bf16.msra.mxu2 %v1007_v6  ;;  %v1013_v15 = vld [vmem:[#allocation6 + $0xe0] sm:$0xff]  ;;  %v1012_v19 = vld [vmem:[#allocation6 + $0xd8] sm:$0xff]  ;;  %v1003_v22 = vld [vmem:[#allocation6 + $0x90] sm:$0xff] }
  0x13   :  { %639 = vmatpush.bf16.msra.mxu3 %v1015_v7  ;;  %v1011_v23 = vld [vmem:[#allocation6 + $0xd0] sm:$0xff]  ;;  %v986_v24 = vld [vmem:[#allocation6 + $0x8] sm:$0xff]  ;;  %v55_v29 = vld [vmem:[#allocation3] sm:$0xff] }
  0x14   :  { %601 = vmatpush.bf16.msra.mxu0 %v990_v8  ;;  %v994_v25 = vld [vmem:[#allocation6 + $0x48] sm:$0xff]  ;;  %v985_v30 = vld [vmem:[#allocation6] sm:$0xff]  ;;  %v191_v33 = vunpack.c.l.b16 %v55_v29  ;;  %v192_v37 = vunpack.c.h.b16 %v55_v29  ;;  %v1024_v38 = vld [vmem:[#allocation6 + $0x138] sm:$0xff] }
  0x15   :  { %614 = vmatpush.bf16.msra.mxu1 %v998_v9  ;;  %v1002_v26 = vld [vmem:[#allocation6 + $0x88] sm:$0xff]  ;;  %v993_v31 = vld [vmem:[#allocation6 + $0x40] sm:$0xff]  ;;  %v1032_v39 = vld [vmem:[#allocation6 + $0x178] sm:$0xff] }
  0x16   :  { %627 = vmatpush.bf16.msra.mxu2 %v1006_v10  ;;  %v1010_v27 = vld [vmem:[#allocation6 + $0xc8] sm:$0xff]  ;;  %v1001_v34 = vld [vmem:[#allocation6 + $0x80] sm:$0xff]  ;;  %v1040_v40 = vld [vmem:[#allocation6 + $0x1b8] sm:$0xff]  ;;  %v199_v43 = vpack.c.b16 %v191_v33, %v191_v33  ;;  %v200_v45 = vpack.c.b16 %v192_v37, %v192_v37 }
  0x17   :  { %640 = vmatpush.bf16.msra.mxu3 %v1014_v11  ;;  %v56_v28 = vld [vmem:[#allocation3 + $0x8] sm:$0xff]  ;;  %v1009_v35 = vld [vmem:[#allocation6 + $0xc0] sm:$0xff]  ;;  %v1048_v41 = vld [vmem:[#allocation6 + $0x1f8] sm:$0xff] }
  0x18   :  { %602 = vmatpush.bf16.msra.mxu0 %v989_v12  ;;  %v193_v32 = vunpack.c.l.b16 %v56_v28  ;;  %v194_v36 = vunpack.c.h.b16 %v56_v28  ;;  %v1023_v46 = vld [vmem:[#allocation6 + $0x130] sm:$0xff]  ;;  %v1022_v50 = vld [vmem:[#allocation6 + $0x128] sm:$0xff]  ;;  %v1021_v54 = vld [vmem:[#allocation6 + $0x120] sm:$0xff] }
  0x19   :  { %615 = vmatpush.bf16.msra.mxu1 %v997_v13  ;;  %v1031_v47 = vld [vmem:[#allocation6 + $0x170] sm:$0xff]  ;;  %v1030_v51 = vld [vmem:[#allocation6 + $0x168] sm:$0xff]  ;;  %v1029_v55 = vld [vmem:[#allocation6 + $0x160] sm:$0xff] }
  0x1a   :  { %628 = vmatpush.bf16.msra.mxu2 %v1005_v14  ;;  %v201_v42 = vpack.c.b16 %v193_v32, %v193_v32  ;;  %v202_v44 = vpack.c.b16 %v194_v36, %v194_v36  ;;  %v1039_v48 = vld [vmem:[#allocation6 + $0x1b0] sm:$0xff]  ;;  %v1038_v52 = vld [vmem:[#allocation6 + $0x1a8] sm:$0xff]  ;;  %v1037_v56 = vld [vmem:[#allocation6 + $0x1a0] sm:$0xff] }
  0x1b   :  { %641 = vmatpush.bf16.msra.mxu3 %v1013_v15  ;;  %v1047_v49 = vld [vmem:[#allocation6 + $0x1f0] sm:$0xff]  ;;  %v1046_v53 = vld [vmem:[#allocation6 + $0x1e8] sm:$0xff]  ;;  %v1045_v57 = vld [vmem:[#allocation6 + $0x1e0] sm:$0xff] }
  0x1c   :  { %603 = vmatpush.bf16.msra.mxu0 %v988_v16  ;;  %v1020_v58 = vld [vmem:[#allocation6 + $0x118] sm:$0xff]  ;;  %v1019_v62 = vld [vmem:[#allocation6 + $0x110] sm:$0xff]  ;;  %v1018_v2 = vld [vmem:[#allocation6 + $0x108] sm:$0xff] }
  0x1d   :  { %616 = vmatpush.bf16.msra.mxu1 %v996_v17  ;;  %v1028_v59 = vld [vmem:[#allocation6 + $0x158] sm:$0xff]  ;;  %v1027_v63 = vld [vmem:[#allocation6 + $0x150] sm:$0xff]  ;;  %v1026_v3 = vld [vmem:[#allocation6 + $0x148] sm:$0xff] }
  0x1e   :  { %629 = vmatpush.bf16.msra.mxu2 %v1004_v18  ;;  %v1036_v60 = vld [vmem:[#allocation6 + $0x198] sm:$0xff]  ;;  %v1035_v0 = vld [vmem:[#allocation6 + $0x190] sm:$0xff]  ;;  %v1034_v5 = vld [vmem:[#allocation6 + $0x188] sm:$0xff] }
  0x1f   :  { %642 = vmatpush.bf16.msra.mxu3 %v1012_v19  ;;  %v1044_v61 = vld [vmem:[#allocation6 + $0x1d8] sm:$0xff]  ;;  %v1043_v1 = vld [vmem:[#allocation6 + $0x1d0] sm:$0xff]  ;;  %v1042_v6 = vld [vmem:[#allocation6 + $0x1c8] sm:$0xff] }
  0x20   :  { %604 = vmatpush.bf16.msra.mxu0 %v987_v20  ;;  %v57_v4 = vld [vmem:[#allocation3 + $0x10] sm:$0xff]  ;;  %v58_v7 = vld [vmem:[#allocation3 + $0x18] sm:$0xff]  ;;  %v1017_v10 = vld [vmem:[#allocation6 + $0x100] sm:$0xff] }
  0x21   :  { %617 = vmatpush.bf16.msra.mxu1 %v995_v21  ;;  %v195_v8 = vunpack.c.l.b16 %v57_v4  ;;  %v196_v9 = vunpack.c.h.b16 %v57_v4  ;;  %v1025_v11 = vld [vmem:[#allocation6 + $0x140] sm:$0xff]  ;;  %v197_v12 = vunpack.c.l.b16 %v58_v7  ;;  %v198_v13 = vunpack.c.h.b16 %v58_v7 }
  0x22   :  { %630 = vmatpush.bf16.msra.mxu2 %v1003_v22  ;;  %v1033_v14 = vld [vmem:[#allocation6 + $0x180] sm:$0xff] }
  0x23   :  { %643 = vmatpush.bf16.msra.mxu3 %v1011_v23  ;;  %v1041_v15 = vld [vmem:[#allocation6 + $0x1c0] sm:$0xff]  ;;  %v203_v16 = vpack.c.b16 %v195_v8, %v195_v8  ;;  %v204_v17 = vpack.c.b16 %v196_v9, %v196_v9  ;;  %v205_v18 = vpack.c.b16 %v197_v12, %v197_v12  ;;  %v206_v19 = vpack.c.b16 %v198_v13, %v198_v13 }
  0x24   :  { %605 = vmatpush.bf16.msra.mxu0 %v986_v24 }
  0x25   :  { %618 = vmatpush.bf16.msra.mxu1 %v994_v25 }
  0x26   :  { %631 = vmatpush.bf16.msra.mxu2 %v1002_v26 }
  0x27   :  { %644 = vmatpush.bf16.msra.mxu3 %v1010_v27 }
  0x28   :  { %606 = vmatpush.bf16.msra.mxu0 %v985_v30 }
  0x29   :  { %619 = vmatpush.bf16.msra.mxu1 %v993_v31 }
  0x2a   :  { %632 = vmatpush.bf16.msra.mxu2 %v1001_v34 }
  0x2b   :  { %645 = vmatpush.bf16.msra.mxu3 %v1009_v35  ;;  %607 = vmatmul.bf16.vlgmr.msra.gmra.mxu0 %v199_v43 }
  0x2c   :  { %651 = vmatpush.bf16.msrb.mxu0 %v1024_v38  ;;  %620 = vmatmul.bf16.vlgmr.msra.gmra.mxu1 %v200_v45  ;;  %v1054_v38 = vld [vmem:[%s1172_s2] ss:$0 sm:$0xff] }
  0x2d   :  { %664 = vmatpush.bf16.msrb.mxu1 %v1032_v39  ;;  %633 = vmatmul.bf16.vlgmr.msra.gmra.mxu2 %v201_v42 }
  0x2e   :  { %677 = vmatpush.bf16.msrb.mxu2 %v1040_v40  ;;  %646 = vmatmul.bf16.vlgmr.msra.gmra.mxu3 %v202_v44 }
  0x2f   :  { %690 = vmatpush.bf16.msrb.mxu3 %v1048_v41 }
  0x30   :  { %652 = vmatpush.bf16.msrb.mxu0 %v1023_v46 }
  0x31   :  { %665 = vmatpush.bf16.msrb.mxu1 %v1031_v47 }
  0x32   :  { %678 = vmatpush.bf16.msrb.mxu2 %v1039_v48 }
  0x33   :  { %691 = vmatpush.bf16.msrb.mxu3 %v1047_v49 }
  0x34   :  { %653 = vmatpush.bf16.msrb.mxu0 %v1022_v50 }
  0x35   :  { %666 = vmatpush.bf16.msrb.mxu1 %v1030_v51 }
  0x36   :  { %679 = vmatpush.bf16.msrb.mxu2 %v1038_v52 }
  0x37   :  { %692 = vmatpush.bf16.msrb.mxu3 %v1046_v53 }
  0x38   :  { %654 = vmatpush.bf16.msrb.mxu0 %v1021_v54 }
  0x39   :  { %667 = vmatpush.bf16.msrb.mxu1 %v1029_v55 }
  0x3a   :  { %680 = vmatpush.bf16.msrb.mxu2 %v1037_v56 }
  0x3b   :  { %693 = vmatpush.bf16.msrb.mxu3 %v1045_v57 }
  0x3c   :  { %655 = vmatpush.bf16.msrb.mxu0 %v1020_v58 }
  0x3d   :  { %668 = vmatpush.bf16.msrb.mxu1 %v1028_v59 }
  0x3e   :  { %681 = vmatpush.bf16.msrb.mxu2 %v1036_v60 }
  0x3f   :  { %694 = vmatpush.bf16.msrb.mxu3 %v1044_v61 }
  0x40   :  { %656 = vmatpush.bf16.msrb.mxu0 %v1019_v62 }
  0x41   :  { %669 = vmatpush.bf16.msrb.mxu1 %v1027_v63 }
  0x42   :  { %682 = vmatpush.bf16.msrb.mxu2 %v1035_v0 }
  0x43   :  { %695 = vmatpush.bf16.msrb.mxu3 %v1043_v1 }
  0x44   :  { %657 = vmatpush.bf16.msrb.mxu0 %v1018_v2 }
  0x45   :  { %670 = vmatpush.bf16.msrb.mxu1 %v1026_v3 }
  0x46   :  { %683 = vmatpush.bf16.msrb.mxu2 %v1034_v5 }
  0x47   :  { %696 = vmatpush.bf16.msrb.mxu3 %v1042_v6 }
  0x48   :  { %658 = vmatpush.bf16.msrb.mxu0 %v1017_v10 }
  0x49   :  { %671 = vmatpush.bf16.msrb.mxu1 %v1025_v11 }
  0x4a   :  { %684 = vmatpush.bf16.msrb.mxu2 %v1033_v14 }
  0x4b   :  { %697 = vmatpush.bf16.msrb.mxu3 %v1041_v15  ;;  %659 = vmatmul.bf16.vlgmr.msrb.gmra.mxu0 %v203_v16 }
  0x4c   :  { %672 = vmatmul.bf16.vlgmr.msrb.gmra.mxu1 %v204_v17 }
  0x4d   :  { %685 = vmatmul.bf16.vlgmr.msrb.gmra.mxu2 %v205_v18 }
  0x4e   :  { %698 = vmatmul.bf16.vlgmr.msrb.gmra.mxu3 %v206_v19 }
  0xa8   :  { %v608_v20 = vpop.f32.mrf.mxu0 }
  0xa9   :  { %v621_v21 = vpop.f32.mrf.mxu1 }
  0xaa   :  { %v622_v28 = vadd.f32 %v621_v21, %v608_v20 }
  0xb0   :  { %v634_v22 = vpop.f32.mrf.mxu2  ;;  %v610_v24 = vpop.f32.mrf.mxu0 }
  0xb1   :  { %v647_v23 = vpop.f32.mrf.mxu3  ;;  %v623_v25 = vpop.f32.mrf.mxu1  ;;  %v635_v29 = vadd.f32 %v634_v22, %v622_v28 }
  0xb3   :  { %v648_v30 = vadd.f32 %v647_v23, %v635_v29 }
  0xb8   :  { %v636_v26 = vpop.f32.mrf.mxu2 }
  0xb9   :  { %v649_v27 = vpop.f32.mrf.mxu3 }
  0xc8   :  { %v660_v31 = vpop.f32.mrf.mxu0 }
  0xc9   :  { %v673_v32 = vpop.f32.mrf.mxu1  ;;  %v661_v33 = vadd.f32 %v660_v31, %v648_v30 }
  0xcb   :  { %v674_v34 = vadd.f32 %v673_v32, %v661_v33 }
  0xd0   :  { %v686_v35 = vpop.f32.mrf.mxu2  ;;  %v662_v39 = vpop.f32.mrf.mxu0 }
  0xd1   :  { %v699_v36 = vpop.f32.mrf.mxu3  ;;  %v687_v37 = vadd.f32 %v686_v35, %v674_v34  ;;  %v675_v40 = vpop.f32.mrf.mxu1 }
  0xd3   :  { %v700_v41 = vadd.f32 %v699_v36, %v687_v37 }
  0xd5   :  { %v703_v42 = vadd.f32 %v1054_v38, %v700_v41 }
  0xd7   :  { %v709_v43 = vmax.f32 %v703_v42, 0.0 }
  0xd8   :  { %v688_v44 = vpop.f32.mrf.mxu2 }
  0xd9   :  { %v701_v45 = vpop.f32.mrf.mxu3  ;;  %710 = vst [vmem:[#allocation8] sm:$0xff] %v709_v43 }
  0xda   :  { %721 = dma.vmem_to_hbm [thread:$0]  %s717_s25, 128, %s719_s28, [#allocation5]  }
  0xdb   :  { %1131 = dma.done.wait [#allocation5], 128  }
  0xdc   :  { %1132 = vsyncadd [#allocation5], 4294967168 }
  0xdd   :  { %726 = vsyncpa [#allocation4], 1 }
  0xde   :  { %727 = vsyncpa [#allocation7], 1 }
  0xdf   :  { %728 = vsyncpa [#allocation5], 1 }

</bundles_post_ra>
